<compile_context>
chip_gen: v6e
topology: v6e:2x2x1
jax: 0.10.0
libtpu: 0.0.40
codegen_flags: <defaults>
</compile_context>

<pallas_src>
import functools

import jax
import jax.numpy as jnp
from jax.experimental import pallas as pl
from jax.experimental.pallas import tpu as pltpu


def attention_kernel(x_ref, g_ref, b_ref, wqkv_ref, wout_ref, o_ref, head_out,
                     *, heads, dim_head, eps):
    x = x_ref[0]  # (N, D) for the current batch element, f32

    # --- LayerNorm over the feature (last) dim, PyTorch default eps=1e-5 (f32) ---
    mu = jnp.mean(x, axis=-1, keepdims=True)
    xc = x - mu
    var = jnp.mean(xc * xc, axis=-1, keepdims=True)
    xn = (xc * jax.lax.rsqrt(var + eps)) * g_ref[0] + b_ref[0]

    inner = heads * dim_head

    # --- QKV projection (no bias): bf16 operands, f32 MXU accumulation.
    # The softmax scale was pre-folded into the q-columns of w_qkv on the host. ---
    qkv = jnp.dot(xn.astype(jnp.bfloat16), wqkv_ref[...],
                  preferred_element_type=jnp.float32)  # (N, 3*inner) f32

    # --- per-head attention on contiguous (N, Dh) column slices of qkv ---
    for h in range(heads):
        lo = h * dim_head
        q_h = qkv[:, lo:lo + dim_head].astype(jnp.bfloat16)
        k_h = qkv[:, inner + lo:inner + lo + dim_head].astype(jnp.bfloat16)
        v_h = qkv[:, 2 * inner + lo:2 * inner + lo + dim_head].astype(jnp.bfloat16)

        # q @ k^T without materializing a transpose
        dots = jax.lax.dot_general(q_h, k_h, (((1,), (1,)), ((), ())),
                                   preferred_element_type=jnp.float32)  # (N, N)
        m = jnp.max(dots, axis=-1, keepdims=True)
        e = jnp.exp(dots - m)
        l = jnp.sum(e, axis=-1, keepdims=True)

        # un-normalized PV matmul; normalize the small (N, Dh) output with EUP recip
        pv = jnp.dot(e.astype(jnp.bfloat16), v_h,
                     preferred_element_type=jnp.float32)                # (N, Dh)
        head_out[:, lo:lo + dim_head] = pv * pl.reciprocal(l, approx=True)

    # --- output projection (no bias): single (N, inner) @ (inner, D) matmul ---
    o_ref[0] = jnp.dot(head_out[...].astype(jnp.bfloat16), wout_ref[...],
                       preferred_element_type=jnp.float32)


def attention_forward(x, gamma, beta, w_qkv, w_out, *, heads, dim_head):
    """x: (B, N, D) float32. Returns (B, N, D) float32."""
    B, N, D = x.shape
    inner = heads * dim_head
    scale = float(dim_head) ** -0.5

    kernel = functools.partial(
        attention_kernel, heads=heads, dim_head=dim_head, eps=1e-5)

    gamma2 = gamma.reshape(1, D).astype(jnp.float32)
    beta2 = beta.reshape(1, D).astype(jnp.float32)

    # Fold the softmax scale into the q-projection columns (done in f32 on host),
    # then ship weights as bf16: MXU runs at bf16 peak and DMA bytes are halved
    # (f32 accumulation is requested explicitly at every dot).
    w_qkv_scaled = jnp.concatenate(
        [w_qkv[:, :inner] * scale, w_qkv[:, inner:]], axis=1)
    w_qkv_bf16 = w_qkv_scaled.astype(jnp.bfloat16)
    w_out_bf16 = w_out.astype(jnp.bfloat16)

    return pl.pallas_call(
        kernel,
        out_shape=jax.ShapeDtypeStruct((B, N, D), jnp.float32),
        grid_spec=pltpu.PrefetchScalarGridSpec(
            num_scalar_prefetch=0,
            grid=(B,),
            in_specs=[
                pl.BlockSpec((1, N, D), lambda b: (b, 0, 0)),            # x
                pl.BlockSpec((1, D), lambda b: (0, 0)),                  # ln gamma
                pl.BlockSpec((1, D), lambda b: (0, 0)),                  # ln beta
                pl.BlockSpec((D, 3 * inner), lambda b: (0, 0)),          # w_qkv (bf16)
                pl.BlockSpec((inner, D), lambda b: (0, 0)),              # w_out (bf16)
            ],
            out_specs=pl.BlockSpec((1, N, D), lambda b: (b, 0, 0)),
            scratch_shapes=[pltpu.VMEM((N, inner), jnp.float32)],        # per-head outs
        ),
        compiler_params=pltpu.CompilerParams(
            dimension_semantics=("parallel",),
            vmem_limit_bytes=64 * 1024 * 1024),
    )(x, gamma2, beta2, w_qkv_bf16, w_out_bf16)


def attention_reference(x, gamma, beta, w_qkv, w_out, *, heads, dim_head):
    """Pure-JAX f32 reference matching the PyTorch forward."""
    B, N, D = x.shape
    inner = heads * dim_head
    scale = float(dim_head) ** -0.5
    mu = jnp.mean(x, axis=-1, keepdims=True)
    var = jnp.mean((x - mu) ** 2, axis=-1, keepdims=True)
    xn = (x - mu) / jnp.sqrt(var + 1e-5) * gamma + beta
    qkv = xn @ w_qkv
    q, k, v = jnp.split(qkv, 3, axis=-1)
    def heads_split(t):
        return t.reshape(B, N, heads, dim_head).transpose(0, 2, 1, 3)
    q, k, v = heads_split(q), heads_split(k), heads_split(v)
    dots = jnp.einsum('bhqd,bhkd->bhqk', q, k) * scale
    attn = jax.nn.softmax(dots, axis=-1)
    out = jnp.einsum('bhqk,bhkd->bhqd', attn, v)
    out = out.transpose(0, 2, 1, 3).reshape(B, N, inner)
    return out @ w_out


if __name__ == "__main__":
    # Small shapes consistent with the module: batch=2, seq=8, dim=32, heads=4, dim_head=8.
    B, N, D = 2, 8, 32
    heads, dim_head = 4, 8
    inner = heads * dim_head

    key = jax.random.PRNGKey(0)
    kx, kq, ko = jax.random.split(key, 3)

    x = jax.random.normal(kx, (B, N, D), dtype=jnp.float32)

    # Deterministic parameter init (PyTorch-style: Linear ~ U(-1/sqrt(fan_in), 1/sqrt(fan_in)),
    # LayerNorm weight=1, bias=0).
    bound_qkv = 1.0 / (D ** 0.5)
    bound_out = 1.0 / (inner ** 0.5)
    w_qkv = jax.random.uniform(kq, (D, 3 * inner), jnp.float32, -bound_qkv, bound_qkv)
    w_out = jax.random.uniform(ko, (inner, D), jnp.float32, -bound_out, bound_out)
    gamma = jnp.ones((D,), jnp.float32)
    beta = jnp.zeros((D,), jnp.float32)

    y = attention_forward(x, gamma, beta, w_qkv, w_out, heads=heads, dim_head=dim_head)
    y = jax.block_until_ready(y)

    y_ref = attention_reference(x, gamma, beta, w_qkv, w_out, heads=heads, dim_head=dim_head)
    assert y.shape == (B, N, D)
    # bf16 MXU operands (f32 accumulation) -> relaxed tolerance vs. the f32 reference.
    assert jnp.allclose(y, y_ref, atol=5e-2, rtol=5e-2), "Pallas kernel mismatch vs reference"

    print("KERNEL_OK")
</pallas_src>

<mosaic_0001>
module attributes {stable_mosaic.version = 11 : i64} {
  func.func @attention_kernel(%arg0: i32, %arg1: memref<1x8x32xf32, #tpu.memory_space<vmem>>, %arg2: memref<1x32xf32, #tpu.memory_space<vmem>>, %arg3: memref<1x32xf32, #tpu.memory_space<vmem>>, %arg4: memref<32x96xbf16, #tpu.memory_space<vmem>>, %arg5: memref<32x32xbf16, #tpu.memory_space<vmem>>, %arg6: memref<1x8x32xf32, #tpu.memory_space<vmem>>, %arg7: memref<8x32xf32, #tpu.memory_space<vmem>>) attributes {dimension_semantics = [#tpu.dimension_semantics<parallel>], iteration_bounds = array<i64: 2>, scalar_prefetch = 0 : i64, scratch_operands = 1 : i64, tpu.core_type = #tpu.core_type<tc>, window_params = [{transform_indices = @transform_0, window_bounds = array<i64: 1, 8, 32>}, {pipeline_mode = #tpu.pipeline_mode<synchronous>, transform_indices = @transform_1, window_bounds = array<i64: 1, 32>}, {pipeline_mode = #tpu.pipeline_mode<synchronous>, transform_indices = @transform_2, window_bounds = array<i64: 1, 32>}, {pipeline_mode = #tpu.pipeline_mode<synchronous>, transform_indices = @transform_3, window_bounds = array<i64: 32, 96>}, {pipeline_mode = #tpu.pipeline_mode<synchronous>, transform_indices = @transform_4, window_bounds = array<i64: 32, 32>}, {transform_indices = @transform_5, window_bounds = array<i64: 1, 8, 32>}]} {
    %c0 = arith.constant 0 : index
    %c0_0 = arith.constant 0 : index
    %c0_1 = arith.constant 0 : index
    %0 = vector.load %arg1[%c0, %c0_0, %c0_1] : memref<1x8x32xf32, #tpu.memory_space<vmem>>, vector<1x8x32xf32>
    %1 = vector.shape_cast %0 : vector<1x8x32xf32> to vector<8x32xf32>
    %cst = arith.constant dense<0.000000e+00> : vector<8xf32>
    %2 = vector.multi_reduction <add>, %1, %cst [1] : vector<8x32xf32> to vector<8xf32>
    %3 = vector.shape_cast %2 : vector<8xf32> to vector<8x1xf32>
    %cst_2 = arith.constant 3.200000e+01 : f32
    %4 = vector.broadcast %cst_2 : f32 to vector<8x1xf32>
    %5 = arith.divf %3, %4 : vector<8x1xf32>
    %6 = vector.broadcast %5 : vector<8x1xf32> to vector<8x32xf32>
    %7 = arith.subf %1, %6 : vector<8x32xf32>
    %8 = arith.mulf %7, %7 : vector<8x32xf32>
    %cst_3 = arith.constant dense<0.000000e+00> : vector<8xf32>
    %9 = vector.multi_reduction <add>, %8, %cst_3 [1] : vector<8x32xf32> to vector<8xf32>
    %10 = vector.shape_cast %9 : vector<8xf32> to vector<8x1xf32>
    %cst_4 = arith.constant 3.200000e+01 : f32
    %11 = vector.broadcast %cst_4 : f32 to vector<8x1xf32>
    %12 = arith.divf %10, %11 : vector<8x1xf32>
    %cst_5 = arith.constant 9.99999974E-6 : f32
    %13 = vector.broadcast %cst_5 : f32 to vector<8x1xf32>
    %14 = arith.addf %12, %13 : vector<8x1xf32>
    %15 = math.rsqrt %14 : vector<8x1xf32>
    %16 = vector.broadcast %15 : vector<8x1xf32> to vector<8x32xf32>
    %17 = arith.mulf %7, %16 : vector<8x32xf32>
    %c0_6 = arith.constant 0 : index
    %c0_7 = arith.constant 0 : index
    %18 = vector.load %arg2[%c0_6, %c0_7] : memref<1x32xf32, #tpu.memory_space<vmem>>, vector<1x32xf32>
    %19 = vector.shape_cast %18 : vector<1x32xf32> to vector<32xf32>
    %20 = vector.shape_cast %19 : vector<32xf32> to vector<1x32xf32>
    %21 = vector.broadcast %20 : vector<1x32xf32> to vector<8x32xf32>
    %22 = arith.mulf %17, %21 : vector<8x32xf32>
    %c0_8 = arith.constant 0 : index
    %c0_9 = arith.constant 0 : index
    %23 = vector.load %arg3[%c0_8, %c0_9] : memref<1x32xf32, #tpu.memory_space<vmem>>, vector<1x32xf32>
    %24 = vector.shape_cast %23 : vector<1x32xf32> to vector<32xf32>
    %25 = vector.shape_cast %24 : vector<32xf32> to vector<1x32xf32>
    %26 = vector.broadcast %25 : vector<1x32xf32> to vector<8x32xf32>
    %27 = arith.addf %22, %26 : vector<8x32xf32>
    %28 = arith.truncf %27 : vector<8x32xf32> to vector<8x32xbf16>
    %c0_10 = arith.constant 0 : index
    %c0_11 = arith.constant 0 : index
    %29 = vector.load %arg4[%c0_10, %c0_11] : memref<32x96xbf16, #tpu.memory_space<vmem>>, vector<32x96xbf16>
    %cst_12 = arith.constant dense<0.000000e+00> : vector<8x96xf32>
    %30 = tpu.matmul %28, %29, %cst_12 {dimension_numbers = #tpu.dot_dimension_numbers<[1], [0], [0], [1], [0, 0, 1, 1], [], []>} : vector<8x32xbf16>, vector<32x96xbf16>, vector<8x96xf32> -> vector<8x96xf32>
    %31 = vector.extract_strided_slice %30 {offsets = [0, 0], sizes = [8, 8], strides = [1, 1]} : vector<8x96xf32> to vector<8x8xf32>
    %32 = arith.truncf %31 : vector<8x8xf32> to vector<8x8xbf16>
    %33 = vector.extract_strided_slice %30 {offsets = [0, 32], sizes = [8, 8], strides = [1, 1]} : vector<8x96xf32> to vector<8x8xf32>
    %34 = arith.truncf %33 : vector<8x8xf32> to vector<8x8xbf16>
    %35 = vector.extract_strided_slice %30 {offsets = [0, 64], sizes = [8, 8], strides = [1, 1]} : vector<8x96xf32> to vector<8x8xf32>
    %36 = arith.truncf %35 : vector<8x8xf32> to vector<8x8xbf16>
    %cst_13 = arith.constant dense<0.000000e+00> : vector<8x8xf32>
    %37 = tpu.matmul %32, %34, %cst_13 {dimension_numbers = #tpu.dot_dimension_numbers<[1], [1], [0], [0], [0, 0, 1, 0], [], []>} : vector<8x8xbf16>, vector<8x8xbf16>, vector<8x8xf32> -> vector<8x8xf32>
    %cst_14 = arith.constant dense<0xFF800000> : vector<8xf32>
    %38 = vector.multi_reduction <maximumf>, %37, %cst_14 [1] : vector<8x8xf32> to vector<8xf32>
    %39 = vector.shape_cast %38 : vector<8xf32> to vector<8x1xf32>
    %40 = vector.broadcast %39 : vector<8x1xf32> to vector<8x8xf32>
    %41 = arith.subf %37, %40 : vector<8x8xf32>
    %42 = math.exp %41 : vector<8x8xf32>
    %cst_15 = arith.constant dense<0.000000e+00> : vector<8xf32>
    %43 = vector.multi_reduction <add>, %42, %cst_15 [1] : vector<8x8xf32> to vector<8xf32>
    %44 = vector.shape_cast %43 : vector<8xf32> to vector<8x1xf32>
    %45 = arith.truncf %42 : vector<8x8xf32> to vector<8x8xbf16>
    %cst_16 = arith.constant dense<0.000000e+00> : vector<8x8xf32>
    %46 = tpu.matmul %45, %36, %cst_16 {dimension_numbers = #tpu.dot_dimension_numbers<[1], [0], [0], [1], [0, 0, 1, 1], [], []>} : vector<8x8xbf16>, vector<8x8xbf16>, vector<8x8xf32> -> vector<8x8xf32>
    %47 = tpu.reciprocal %44 {approx = true} : vector<8x1xf32> -> vector<8x1xf32>
    %48 = vector.broadcast %47 : vector<8x1xf32> to vector<8x8xf32>
    %49 = arith.mulf %46, %48 : vector<8x8xf32>
    %c0_17 = arith.constant 0 : index
    %c0_18 = arith.constant 0 : index
    %50 = vector.load %arg7[%c0_17, %c0_18] : memref<8x32xf32, #tpu.memory_space<vmem>>, vector<8x8xf32>
    tpu.vector_store %arg7[%c0_17, %c0_18], %49 {strides = array<i32>} : memref<8x32xf32, #tpu.memory_space<vmem>>, vector<8x8xf32>,
    %51 = vector.extract_strided_slice %30 {offsets = [0, 8], sizes = [8, 8], strides = [1, 1]} : vector<8x96xf32> to vector<8x8xf32>
    %52 = arith.truncf %51 : vector<8x8xf32> to vector<8x8xbf16>
    %53 = vector.extract_strided_slice %30 {offsets = [0, 40], sizes = [8, 8], strides = [1, 1]} : vector<8x96xf32> to vector<8x8xf32>
    %54 = arith.truncf %53 : vector<8x8xf32> to vector<8x8xbf16>
    %55 = vector.extract_strided_slice %30 {offsets = [0, 72], sizes = [8, 8], strides = [1, 1]} : vector<8x96xf32> to vector<8x8xf32>
    %56 = arith.truncf %55 : vector<8x8xf32> to vector<8x8xbf16>
    %cst_19 = arith.constant dense<0.000000e+00> : vector<8x8xf32>
    %57 = tpu.matmul %52, %54, %cst_19 {dimension_numbers = #tpu.dot_dimension_numbers<[1], [1], [0], [0], [0, 0, 1, 0], [], []>} : vector<8x8xbf16>, vector<8x8xbf16>, vector<8x8xf32> -> vector<8x8xf32>
    %cst_20 = arith.constant dense<0xFF800000> : vector<8xf32>
    %58 = vector.multi_reduction <maximumf>, %57, %cst_20 [1] : vector<8x8xf32> to vector<8xf32>
    %59 = vector.shape_cast %58 : vector<8xf32> to vector<8x1xf32>
    %60 = vector.broadcast %59 : vector<8x1xf32> to vector<8x8xf32>
    %61 = arith.subf %57, %60 : vector<8x8xf32>
    %62 = math.exp %61 : vector<8x8xf32>
    %cst_21 = arith.constant dense<0.000000e+00> : vector<8xf32>
    %63 = vector.multi_reduction <add>, %62, %cst_21 [1] : vector<8x8xf32> to vector<8xf32>
    %64 = vector.shape_cast %63 : vector<8xf32> to vector<8x1xf32>
    %65 = arith.truncf %62 : vector<8x8xf32> to vector<8x8xbf16>
    %cst_22 = arith.constant dense<0.000000e+00> : vector<8x8xf32>
    %66 = tpu.matmul %65, %56, %cst_22 {dimension_numbers = #tpu.dot_dimension_numbers<[1], [0], [0], [1], [0, 0, 1, 1], [], []>} : vector<8x8xbf16>, vector<8x8xbf16>, vector<8x8xf32> -> vector<8x8xf32>
    %67 = tpu.reciprocal %64 {approx = true} : vector<8x1xf32> -> vector<8x1xf32>
    %68 = vector.broadcast %67 : vector<8x1xf32> to vector<8x8xf32>
    %69 = arith.mulf %66, %68 : vector<8x8xf32>
    %c0_23 = arith.constant 0 : index
    %c8 = arith.constant 8 : index
    %70 = vector.load %arg7[%c0_23, %c8] : memref<8x32xf32, #tpu.memory_space<vmem>>, vector<8x8xf32>
    tpu.vector_store %arg7[%c0_23, %c8], %69 {strides = array<i32>} : memref<8x32xf32, #tpu.memory_space<vmem>>, vector<8x8xf32>,
    %71 = vector.extract_strided_slice %30 {offsets = [0, 16], sizes = [8, 8], strides = [1, 1]} : vector<8x96xf32> to vector<8x8xf32>
    %72 = arith.truncf %71 : vector<8x8xf32> to vector<8x8xbf16>
    %73 = vector.extract_strided_slice %30 {offsets = [0, 48], sizes = [8, 8], strides = [1, 1]} : vector<8x96xf32> to vector<8x8xf32>
    %74 = arith.truncf %73 : vector<8x8xf32> to vector<8x8xbf16>
    %75 = vector.extract_strided_slice %30 {offsets = [0, 80], sizes = [8, 8], strides = [1, 1]} : vector<8x96xf32> to vector<8x8xf32>
    %76 = arith.truncf %75 : vector<8x8xf32> to vector<8x8xbf16>
    %cst_24 = arith.constant dense<0.000000e+00> : vector<8x8xf32>
    %77 = tpu.matmul %72, %74, %cst_24 {dimension_numbers = #tpu.dot_dimension_numbers<[1], [1], [0], [0], [0, 0, 1, 0], [], []>} : vector<8x8xbf16>, vector<8x8xbf16>, vector<8x8xf32> -> vector<8x8xf32>
    %cst_25 = arith.constant dense<0xFF800000> : vector<8xf32>
    %78 = vector.multi_reduction <maximumf>, %77, %cst_25 [1] : vector<8x8xf32> to vector<8xf32>
    %79 = vector.shape_cast %78 : vector<8xf32> to vector<8x1xf32>
    %80 = vector.broadcast %79 : vector<8x1xf32> to vector<8x8xf32>
    %81 = arith.subf %77, %80 : vector<8x8xf32>
    %82 = math.exp %81 : vector<8x8xf32>
    %cst_26 = arith.constant dense<0.000000e+00> : vector<8xf32>
    %83 = vector.multi_reduction <add>, %82, %cst_26 [1] : vector<8x8xf32> to vector<8xf32>
    %84 = vector.shape_cast %83 : vector<8xf32> to vector<8x1xf32>
    %85 = arith.truncf %82 : vector<8x8xf32> to vector<8x8xbf16>
    %cst_27 = arith.constant dense<0.000000e+00> : vector<8x8xf32>
    %86 = tpu.matmul %85, %76, %cst_27 {dimension_numbers = #tpu.dot_dimension_numbers<[1], [0], [0], [1], [0, 0, 1, 1], [], []>} : vector<8x8xbf16>, vector<8x8xbf16>, vector<8x8xf32> -> vector<8x8xf32>
    %87 = tpu.reciprocal %84 {approx = true} : vector<8x1xf32> -> vector<8x1xf32>
    %88 = vector.broadcast %87 : vector<8x1xf32> to vector<8x8xf32>
    %89 = arith.mulf %86, %88 : vector<8x8xf32>
    %c0_28 = arith.constant 0 : index
    %c16 = arith.constant 16 : index
    %90 = vector.load %arg7[%c0_28, %c16] : memref<8x32xf32, #tpu.memory_space<vmem>>, vector<8x8xf32>
    tpu.vector_store %arg7[%c0_28, %c16], %89 {strides = array<i32>} : memref<8x32xf32, #tpu.memory_space<vmem>>, vector<8x8xf32>,
    %91 = vector.extract_strided_slice %30 {offsets = [0, 24], sizes = [8, 8], strides = [1, 1]} : vector<8x96xf32> to vector<8x8xf32>
    %92 = arith.truncf %91 : vector<8x8xf32> to vector<8x8xbf16>
    %93 = vector.extract_strided_slice %30 {offsets = [0, 56], sizes = [8, 8], strides = [1, 1]} : vector<8x96xf32> to vector<8x8xf32>
    %94 = arith.truncf %93 : vector<8x8xf32> to vector<8x8xbf16>
    %95 = vector.extract_strided_slice %30 {offsets = [0, 88], sizes = [8, 8], strides = [1, 1]} : vector<8x96xf32> to vector<8x8xf32>
    %96 = arith.truncf %95 : vector<8x8xf32> to vector<8x8xbf16>
    %cst_29 = arith.constant dense<0.000000e+00> : vector<8x8xf32>
    %97 = tpu.matmul %92, %94, %cst_29 {dimension_numbers = #tpu.dot_dimension_numbers<[1], [1], [0], [0], [0, 0, 1, 0], [], []>} : vector<8x8xbf16>, vector<8x8xbf16>, vector<8x8xf32> -> vector<8x8xf32>
    %cst_30 = arith.constant dense<0xFF800000> : vector<8xf32>
    %98 = vector.multi_reduction <maximumf>, %97, %cst_30 [1] : vector<8x8xf32> to vector<8xf32>
    %99 = vector.shape_cast %98 : vector<8xf32> to vector<8x1xf32>
    %100 = vector.broadcast %99 : vector<8x1xf32> to vector<8x8xf32>
    %101 = arith.subf %97, %100 : vector<8x8xf32>
    %102 = math.exp %101 : vector<8x8xf32>
    %cst_31 = arith.constant dense<0.000000e+00> : vector<8xf32>
    %103 = vector.multi_reduction <add>, %102, %cst_31 [1] : vector<8x8xf32> to vector<8xf32>
    %104 = vector.shape_cast %103 : vector<8xf32> to vector<8x1xf32>
    %105 = arith.truncf %102 : vector<8x8xf32> to vector<8x8xbf16>
    %cst_32 = arith.constant dense<0.000000e+00> : vector<8x8xf32>
    %106 = tpu.matmul %105, %96, %cst_32 {dimension_numbers = #tpu.dot_dimension_numbers<[1], [0], [0], [1], [0, 0, 1, 1], [], []>} : vector<8x8xbf16>, vector<8x8xbf16>, vector<8x8xf32> -> vector<8x8xf32>
    %107 = tpu.reciprocal %104 {approx = true} : vector<8x1xf32> -> vector<8x1xf32>
    %108 = vector.broadcast %107 : vector<8x1xf32> to vector<8x8xf32>
    %109 = arith.mulf %106, %108 : vector<8x8xf32>
    %c0_33 = arith.constant 0 : index
    %c24 = arith.constant 24 : index
    %110 = vector.load %arg7[%c0_33, %c24] : memref<8x32xf32, #tpu.memory_space<vmem>>, vector<8x8xf32>
    tpu.vector_store %arg7[%c0_33, %c24], %109 {strides = array<i32>} : memref<8x32xf32, #tpu.memory_space<vmem>>, vector<8x8xf32>,
    %c0_34 = arith.constant 0 : index
    %c0_35 = arith.constant 0 : index
    %111 = vector.load %arg7[%c0_34, %c0_35] : memref<8x32xf32, #tpu.memory_space<vmem>>, vector<8x32xf32>
    %112 = arith.truncf %111 : vector<8x32xf32> to vector<8x32xbf16>
    %c0_36 = arith.constant 0 : index
    %c0_37 = arith.constant 0 : index
    %113 = vector.load %arg5[%c0_36, %c0_37] : memref<32x32xbf16, #tpu.memory_space<vmem>>, vector<32x32xbf16>
    %cst_38 = arith.constant dense<0.000000e+00> : vector<8x32xf32>
    %114 = tpu.matmul %112, %113, %cst_38 {dimension_numbers = #tpu.dot_dimension_numbers<[1], [0], [0], [1], [0, 0, 1, 1], [], []>} : vector<8x32xbf16>, vector<32x32xbf16>, vector<8x32xf32> -> vector<8x32xf32>
    %c0_39 = arith.constant 0 : index
    %c0_40 = arith.constant 0 : index
    %c0_41 = arith.constant 0 : index
    %115 = vector.load %arg6[%c0_39, %c0_40, %c0_41] : memref<1x8x32xf32, #tpu.memory_space<vmem>>, vector<1x8x32xf32>
    %116 = vector.shape_cast %115 : vector<1x8x32xf32> to vector<8x32xf32>
    %117 = vector.shape_cast %114 : vector<8x32xf32> to vector<1x8x32xf32>
    tpu.vector_store %arg6[%c0_39, %c0_40, %c0_41], %117 {strides = array<i32>} : memref<1x8x32xf32, #tpu.memory_space<vmem>>, vector<1x8x32xf32>,
    return
  }
  func.func @transform_0(%arg0: i32) -> (i32, i32, i32) {
    %c0_i32 = arith.constant 0 : i32
    %c0_i32_0 = arith.constant 0 : i32
    %c0_i32_1 = arith.constant 0 : i32
    return %arg0, %c0_i32, %c0_i32_0 : i32, i32, i32
  }
  func.func @transform_1(%arg0: i32) -> (i32, i32) {
    %c0_i32 = arith.constant 0 : i32
    %c0_i32_0 = arith.constant 0 : i32
    %c0_i32_1 = arith.constant 0 : i32
    return %c0_i32, %c0_i32_0 : i32, i32
  }
  func.func @transform_2(%arg0: i32) -> (i32, i32) {
    %c0_i32 = arith.constant 0 : i32
    %c0_i32_0 = arith.constant 0 : i32
    %c0_i32_1 = arith.constant 0 : i32
    return %c0_i32, %c0_i32_0 : i32, i32
  }
  func.func @transform_3(%arg0: i32) -> (i32, i32) {
    %c0_i32 = arith.constant 0 : i32
    %c0_i32_0 = arith.constant 0 : i32
    %c0_i32_1 = arith.constant 0 : i32
    return %c0_i32, %c0_i32_0 : i32, i32
  }
  func.func @transform_4(%arg0: i32) -> (i32, i32) {
    %c0_i32 = arith.constant 0 : i32
    %c0_i32_0 = arith.constant 0 : i32
    %c0_i32_1 = arith.constant 0 : i32
    return %c0_i32, %c0_i32_0 : i32, i32
  }
  func.func @transform_5(%arg0: i32) -> (i32, i32, i32) {
    %c0_i32 = arith.constant 0 : i32
    %c0_i32_0 = arith.constant 0 : i32
    %c0_i32_1 = arith.constant 0 : i32
    return %arg0, %c0_i32, %c0_i32_0 : i32, i32, i32
  }
}

</mosaic_0001>

<bundles_post_ra>
// kernel: tpu_custom_call.1
= control target key start
LH: loop header
LB: loop body
LE: loop exit
PB: predicated region body
PF: predicated region fallthrough
CT: control target
= control target key end

     0   :  { %10 = vsyncpa [#allocation4], 0  ;;  %s1678_s0 = inlined_call_operand.hbm [shape: f32[2,8,32], index: 0, kind: input, shape index: {}]   ;;  %s1679_s1 = inlined_call_operand.vmem [shape: f32[1,32], index: 1, kind: input, shape index: {}]   ;;  %s1680_s2 = inlined_call_operand.vmem [shape: f32[1,32], index: 2, kind: input, shape index: {}]   ;;  %s1681_s3 = inlined_call_operand.hbm [shape: bf16[32,96], index: 3, kind: input, shape index: {}]   ;;  %s1682_s4 = inlined_call_operand.hbm [shape: bf16[32,32], index: 4, kind: input, shape index: {}]   ;;  %s1683_s5 = inlined_call_operand.hbm [shape: f32[2,8,32], index: 5, kind: output, shape index: {}]  }
   0x1   :  { %12 = vsyncpa [#allocation4 + $0x1], 0 }
   0x2   :  { %13 = vsyncpa [#allocation7], 0 }
   0x3   :  { %14 = vsyncpa [#allocation5], 0 }
   0x4   :  { %16 = vsyncpa [#allocation5 + $0x1], 0  ;;  %s1415_s18 = smov 0   ;;  %s1417_s19 = smov 0  }
   0x5   :  { %s1419_s20 = smov 0   ;;  %s1421_s21 = smov 0  }
   0x6 LB: > { %s1436_s22 = sadd.s32 4294967295, %s1361_s21   ;;  %s988_s23 = sadd.s32 4294967294, %s1361_s21   ;;  %s1361_s21 = sphi %s1421_s21, %s1705_s21   ;;  %s1357_s20 = sphi %s1419_s20, %s1704_s20   ;;  %s1353_s19 = sphi %s1417_s19, %s1703_s19   ;;  %s1349_s18 = sphi %s1415_s18, %s1702_s18  }
   0x7   : > { %p42_p0 = scmp.ne.s32.totalorder %s1353_s19, %s1349_s18  ;;  %p1684_p1 = scmp.eq.s32.totalorder %s1436_s22, 0 }
   0x8   : > { %p156_p3 = scmp.eq.s32.totalorder %s988_s23, 1  ;;  %p989_p5 = scmp.ge.s32.totalorder %s1361_s21, 1 }
   0x9   : > { %p1445_p4 = por %p1684_p1, %p42_p0  ;;  %p163_p7 = scmp.lt.s32.totalorder %s1361_s21, 3 }
   0xa   : > { %p1450_p6 = por %p156_p3, %p42_p0  ;;  %s1363_s27 = smov [#allocation6]  }
   0xb   : > { %s1688_s24 = scalar_select %p1445_p4, 1, 0 }
   0xc   : > { %s1689_s25 = scalar_select %p1450_p6, 1, 0 }
   0xd   : > { %p1455_p8 = pnand %p989_p5, %p163_p7  ;;  %s181_s28 = sshll.u32 %s1363_s27, 4  ;;  %s182_s28 = int_to_ptr.vmem [resolvable:$true] %s181_s28 }
   0xe   : > { %s1364_s30 = smov [#allocation8]   ;;  %s1224_s7 = scalar_lea.vmem %s182_s28, 256 }
   0xf   : > { %s1690_s26 = scalar_select %p1455_p8, 1, 0 }
  0x10   : > { %p1118_p9 = pneg %p1455_p8  ;;  %s194_s6 = sshll.u32 %s1364_s30, 4  ;;  %s195_s6 = int_to_ptr.vmem [resolvable:$true] %s194_s6 }
  0x11   : > { %p1225_p13 = scmp.ne.s32.totalorder %s182_s28, %s1224_s7  ;;  %p1232_p5 = scmp.lt.s32.totalorder %s182_s28, %s182_s28 }
  0x12   : > { %p1464_p11 = pnand %p1118_p9, %p1684_p1  ;;  %p1233_p7 = scmp.lt.s32.totalorder %s1224_s7, %s1224_s7 }
  0x14   : > { %p1215_p12 = pneg %p1464_p11  ;;  %p1234_p10 = por %p1233_p7, %p1232_p5 }
  0x16   : > { %p1227_p0 = pnand %p1225_p13, %p1215_p12 }
  0x18   : > { %p1228_p3 = pneg %p1227_p0 }
  0x1a   : > { %p1235_p9 = pnand %p1234_p10, %p1228_p3 }
  0x1c   : > { %1238 = shalt.err (!%p1235_p9)
}
  0x1d   : > { %s1365_s8 = smov 64   ;;  %s1366_s9 = smov 4  }
  0x1e   : > { %1121 = dma.hbm_to_vmem [thread:$0]  (!%p1464_p11), %s1681_s3, 256, %s182_s28, [#allocation7], %s1365_s8, %s1365_s8, %s1366_s9  }
  0x1f   : > { %s1250_s12 = scalar_lea.vmem %s195_s6, 256  ;;  %p1258_p2 = scmp.lt.s32.totalorder %s195_s6, %s195_s6 }
  0x20   : > { %p1251_p1 = scmp.ne.s32.totalorder %s195_s6, %s1250_s12  ;;  %p1259_p6 = scmp.lt.s32.totalorder %s1250_s12, %s1250_s12 }
  0x22   : > { %p1253_p13 = pnand %p1251_p1, %p1215_p12  ;;  %p1260_p5 = por %p1259_p6, %p1258_p2 }
  0x24   : > { %p1254_p0 = pneg %p1253_p13 }
  0x26   : > { %p1261_p10 = pnand %p1260_p5, %p1254_p0 }
  0x28   : > { %1264 = shalt.err (!%p1261_p10)
}
  0x29   : > { %1124 = dma.hbm_to_vmem [thread:$0]  (!%p1464_p11), %s1682_s4, 256, %s195_s6, [#allocation7], %s1365_s8, %s1365_s8, %s1366_s9  }
  0x2a   : > { %s1487_s15 = sadd.s32 1, %s1361_s21   ;;  %s29_s16 = sadd.s32 1, %s1357_s20 }
  0x2b   : > { %s26_s17 = ssub.s32 %s1361_s21, %s1487_s15  ;;  %p36_p1 = scmp.ne.s32.totalorder %s1357_s20, %s1353_s19 }
  0x2c   : > { %p27_p2 = scmp.eq.s32.totalorder %s26_s17, 0  ;;  %p37_p6 = scmp.eq.s32.totalorder %s1361_s21, 0 }
  0x2d   : > { %p1692_p12 = scmp.eq.s32.totalorder %s1436_s22, 1  ;;  %p1135_p7 = scmp.lt.s32.totalorder %s1361_s21, 2 }
  0x2e   : > { %s1503_s27 = scalar_select %p27_p2, %s1357_s20, %s29_s16  }
  0x2f   : > { %p1497_p3 = por %p1692_p12, %p36_p1  ;;  %p38_p9 = por %p37_p6, %p36_p1 }
  0x30   : > { %s208_s28 = sand.u32 1, %s1357_s20   ;;  %s994_s30 = sshll.u32 %s1361_s21, 7 }
  0x31   : > { %s1693_s23 = scalar_select %p1497_p3, 1, 0 }
  0x32   : > { %s993_s29 = sshll.u32 %s208_s28, 3  ;;  %s1510_s8 = scalar_lea.hbm %s1678_s0, %s994_s30 }
  0x33   : > { %s212_s9 = scalar_lea.vmem [#allocation3], %s993_s29  ;;  %p1512_p11 = pnand %p1135_p7, %p38_p9 }
  0x34   : > { %s219_s10 = sshll.u32 %s212_s9, 4  ;;  %s209_s12 = scalar_lea.sflag [#allocation4], %s208_s28  ;;  %s220_s10 = int_to_ptr.vmem [resolvable:$true] %s219_s10 }
  0x35   : > { %s1265_s13 = scalar_lea.hbm %s1510_s8, 128  ;;  %p1267_p0 = pneg %p1512_p11 }
  0x36   : > { %p1266_p13 = scmp.ne.s32.totalorder %s1510_s8, %s1265_s13  ;;  %s1270_s17 = scalar_lea.hbm %s1678_s0, 256 }
  0x37   : > { %p1271_p1 = scmp.lt.s32.totalorder %s1510_s8, %s1678_s0  ;;  %p1272_p2 = scmp.lt.s32.totalorder %s1270_s17, %s1265_s13 }
  0x38   : > { %p1268_p5 = pnand %p1267_p0, %p1266_p13 }
  0x39   : > { %p1273_p6 = por %p1272_p2, %p1271_p1 }
  0x3a   : > { %p1269_p10 = pneg %p1268_p5 }
  0x3c   : > { %p1274_p12 = pnand %p1273_p6, %p1269_p10 }
  0x3e   : > { %1277 = shalt.err (!%p1274_p12)
}
  0x3f   : > { %s1278_s6 = scalar_lea.vmem %s220_s10, 128  ;;  %s1367_s28 = smov [#allocation3]  }
  0x40   : > { %p1279_p7 = scmp.ne.s32.totalorder %s220_s10, %s1278_s6  ;;  %s1283_s7 = sshll.u32 %s1367_s28, 4  ;;  %s1284_s7 = int_to_ptr.vmem [resolvable:$false] %s1283_s7 }
  0x41   : > { %s1285_s9 = scalar_lea.vmem %s1284_s7, 256  ;;  %p1286_p13 = scmp.lt.s32.totalorder %s220_s10, %s1284_s7 }
  0x42   : > { %p1281_p9 = pnand %p1279_p7, %p1267_p0  ;;  %p1287_p5 = scmp.lt.s32.totalorder %s1285_s9, %s1278_s6 }
  0x44   : > { %p1282_p3 = pneg %p1281_p9  ;;  %p1288_p4 = por %p1287_p5, %p1286_p13 }
  0x46   : > { %p1289_p8 = pnand %p1288_p4, %p1282_p3 }
  0x48   : > { %1292 = shalt.err (!%p1289_p8)
}
  0x49   : > { %1128 = dma.hbm_to_vmem [thread:$0]  (!%p1512_p11), %s1510_s8, 128, %s220_s10, %s209_s12  }
  0x4a   : > { %p1695_p10 = scmp.ne.s32.totalorder %s1690_s26, 0 }
  0x4b   : > { %s1533_s13 = sand.u32 (!%p1695_p10), 1, %s1353_s19   ;;  %p1696_p4 = scmp.ne.s32.totalorder (!%p1695_p10), %s1688_s24, 0 }
  0x4c   : > { %228 = sbr.rel (%p1695_p10) target bundleno = 1656 (0x678), region = 40  ;;  %s996_s14 = sshll.u32 (!%p1695_p10), %s1533_s13, 3 }
  0x4d   : > { %s231_s16 = scalar_lea.sflag (!%p1695_p10), [#allocation4], %s1533_s13  ;;  %s234_s17 = scalar_lea.vmem (!%p1695_p10), [#allocation3], %s996_s14 }
  0x51   : > { %1336 = dma.done.wait (%p1696_p4), %s231_s16, 128  }
  0x52   : > { %1338 = vsyncadd (%p1696_p4), %s231_s16, 4294967168  ;;  %p1697_p8 = scmp.eq.s32.totalorder %s1436_s22, 0 }
  0x54   : > { %1340 = dma.done.wait (%p1697_p8), [#allocation7], 512   ;;  %p1698_p3 = pmov %p1697_p8 }
  0x55   : > { %vm271_vm0 = vcmask 261120   ;;  %v270_v0 = vld [vmem:[%s234_s17] sm:$0xff]  ;;  %v1191_v7 = vld [vmem:[#allocation6 + $0x8] sm:$0xff]   ;;  %v1368_v8 = vmov 0.0   ;;  %vm1369_vm1 = vmmov 0   ;;  %v1192_v9 = vld [vmem:[#allocation6] sm:$0xff]  }
  0x56   : > { %1342 = vsyncadd (%p1698_p3), [#allocation7], 4294966784  ;;  %v272_v1 = vsel %vm271_vm0, %v270_v0, 0.0  ;;  %1042 = vmatprep.subr.bf16.mxu0 %v1368_v8  ;;  %1046 = vmatprep.mubr.msk.bf16.mxu0 %vm1369_vm1, %v1368_v8  ;;  %v1000_v14 = vld [vmem:[%s1679_s1] ss:$0 sm:$0xff]  ;;  %s1370_s11 = smov 120  }
  0x57   : > { %273 = vadd.xlane.f32.xlu0 %v272_v1  ;;  %1043 = vmatpush3.bf16.msra.mxu0 %v1191_v7  ;;  %v1001_v16 = vld [vmem:[%s1680_s2] ss:$0 sm:$0xff]  ;;  %s1371_s12 = smov 96   ;;  %s1372_s30 = smov 88   ;;  %vm366_vm2 = vcmask 64512   ;;  %vm428_vm3 = vcmask 1043456  }
  0x58   : > { %1050 = vmatprep.subr.bf16.mxu1 %v1368_v8  ;;  %1044 = vmatprep.subr.bf16.mxu0 %v1368_v8  ;;  %s1373_s29 = smov 80   ;;  %s1374_s6 = smov 112   ;;  %vm589_vm4 = vcmask 130112   ;;  %vm705_vm5 = vcmask 195712   ;;  %vm821_vm6 = vcmask 261312  }
  0x59   : > { %1052 = vmatprep.mubr.msk.bf16.mxu1 %vm1369_vm1, %v1368_v8  ;;  %s1375_s28 = smov 72   ;;  %s1376_s7 = smov 104  }
  0x5a   : > { %s1377_s9 = smov 64   ;;  %s1378_s16 = smov 56  }
  0x5b   : > { %1045 = vmatpush3.bf16.msra.mxu0 %v1192_v9  ;;  %s1379_s17 = smov 48   ;;  %s1380_s24 = smov 40  }
  0x5c   : > { %1056 = vmatprep.subr.bf16.mxu0 %v1368_v8  ;;  %s1381_s26 = smov 8   ;;  %s1382_s8 = smov 16  }
  0x5d   : > { %s1383_s10 = smov 24   ;;  %p1699_p0 = scmp.ne.s32.totalorder %s1693_s23, 0 }
  0xe0   : > { %v274_v2 = vpop.xlane.xlu0 %273 }
  0xe1   : > { %v276_v3 = vmul.f32 0.03125, %v274_v2 }
  0xe3   : > { %v277_v4 = vsub.f32 %v270_v0, %v276_v3 }
  0xe5   : > { %v278_v5 = vmul.f32 %v277_v4, %v277_v4 }
  0xe7   : > { %v279_v6 = vsel %vm271_vm0, %v278_v5, 0.0 }
  0xe8   : > { %280 = vadd.xlane.f32.xlu0 %v279_v6 }
 0x171   : > { %v281_v10 = vpop.xlane.xlu0 %280 }
 0x172   : > { %v282_v11 = vmul.f32 0.03125, %v281_v10 }
 0x174   : > { %v283_v12 = vadd.f32 1e-05, %v282_v11 }
 0x176   : > { %1195 = vrsqrt.f32 %v283_v12 }
 0x183   : > { %v1196_v13 = vpop.eup %1195 }
 0x184   : > { %v285_v15 = vmul.f32 %v1196_v13, %v277_v4 }
 0x186   : > { %v293_v17 = vmul.f32 %v1000_v14, %v285_v15 }
 0x188   : > { %v301_v18 = vadd.f32 %v1001_v16, %v293_v17 }
 0x18a   : > { %v302_v19 = vpack.c.bf16 %v301_v18, %v301_v18 }
 0x18c   : > { %1047 = vmatmul.mubr.msk.bf16.vlgmr.msra.gmra.mxu0 %vm271_vm0, %v302_v19 }
 0x18d   : > { %1058 = vmatprep.mubr.msk.bf16.mxu0 %vm1369_vm1, %v1368_v8 }
 0x24c   : > { %v356_v20 = vpop.f32.mrf.mxu0 }
 0x24d   : > { %v1566_v21 = vpack.c.bf16 %v356_v20, %v356_v20 }
 0x24e   : > { %v1048_v22 = vpop.f32.mrf.mxu0 }
 0x24f   : > { %475 = vrot.lane.b32.xlu0 %v1566_v21, %s1370_s11  ;;  %364 = vrot.lane.b32.xlu1 %v1566_v21, %s1371_s12  ;;  %s1017_s11 = sshll.u32 %s1436_s22, 7  ;;  %s268_s12 = scalar_lea.vmem [#allocation9], %s996_s14 }
 0x250   : > { %v359_v23 = vpop.f32.mrf.mxu0  ;;  %s1384_s22 = smov [#allocation9]  }
 0x251   : > { %s1297_s14 = sshll.u32 %s1384_s22, 4  ;;  %s1298_s14 = int_to_ptr.vmem [resolvable:$false] %s1297_s14 }
 0x252   : > { %v1049_v24 = vpop.f32.mrf.mxu0 }
 0x253   : > { %477 = vrot.lane.b32.xlu1 %v1566_v21, %s1372_s30  ;;  %s899_s30 = sshll.u32 %s268_s12, 4  ;;  %s1636_s30 = int_to_ptr.vmem [resolvable:$true] %s899_s30 }
 0x254   : > { %p1300_p6 = scmp.lt.s32.totalorder %s1636_s30, %s1298_s14 }
 0x257   : > { %593 = vrot.lane.b32.xlu1 %v1566_v21, %s1373_s29 }
 0x25b   : > { %591 = vrot.lane.b32.xlu1 %v1566_v21, %s1374_s6 }
 0x25f   : > { %709 = vrot.lane.b32.xlu1 %v1566_v21, %s1375_s28  ;;  %s1634_s28 = scalar_lea.hbm %s1683_s5, %s1017_s11 }
 0x263   : > { %707 = vrot.lane.b32.xlu1 %v1566_v21, %s1376_s7  ;;  %s886_s7 = scalar_lea.sflag [#allocation5], %s1533_s13 }
 0x2c1   : > { %v365_v25 = vpop.permute.xlu1 %364  ;;  %v476_v30 = vpop.permute.xlu0 %475 }
 0x2c2   : > { %v371_v26 = vsel %vm366_vm2, %v365_v25, 0 }
 0x2c3   : > { %1051 = vmatpush3.bf16.xpose.msra.mxu1 %v371_v26 }
 0x2c4   : > { %1062 = vmatprep.subr.bf16.mxu1 %v1368_v8 }
 0x2c5   : > { %v478_v27 = vpop.permute.xlu1 %477 }
 0x2c6   : > { %v483_v28 = vsel %vm366_vm2, %v478_v27, 0 }
 0x2c9   : > { %v594_v29 = vpop.permute.xlu1 %593 }
 0x2ca   : > { %1053 = vmatmul.mubr.msk.bf16.vlgmr.msra.gmra.mxu1 %vm366_vm2, %v1566_v21  ;;  %v599_v32 = vsel %vm366_vm2, %v594_v29, 0 }
 0x2cb   : > { %1063 = vmatpush3.bf16.xpose.msra.mxu1 %v483_v28  ;;  %1064 = vmatprep.mubr.msk.bf16.mxu1 %vm1369_vm1, %v1368_v8 }
 0x2cc   : > { %1074 = vmatprep.subr.bf16.mxu1 %v1368_v8 }
 0x2cd   : > { %v592_v31 = vpop.permute.xlu1 %591 }
 0x2d1   : > { %v710_v33 = vpop.permute.xlu1 %709 }
 0x2d2   : > { %1065 = vmatmul.mubr.msk.bf16.vlgmr.msra.gmra.mxu1 %vm366_vm2, %v476_v30  ;;  %v715_v34 = vsel %vm366_vm2, %v710_v33, 0 }
 0x2d3   : > { %1075 = vmatpush3.bf16.xpose.msra.mxu1 %v599_v32  ;;  %1076 = vmatprep.mubr.msk.bf16.mxu1 %vm1369_vm1, %v1368_v8 }
 0x2d4   : > { %1086 = vmatprep.subr.bf16.mxu1 %v1368_v8 }
 0x2d5   : > { %v708_v35 = vpop.permute.xlu1 %707 }
 0x2da   : > { %1077 = vmatmul.mubr.msk.bf16.vlgmr.msra.gmra.mxu1 %vm366_vm2, %v592_v31 }
 0x2db   : > { %1087 = vmatpush3.bf16.xpose.msra.mxu1 %v715_v34  ;;  %1088 = vmatprep.mubr.msk.bf16.mxu1 %vm1369_vm1, %v1368_v8 }
 0x2dc   : > { %1098 = vmatprep.subr.bf16.mxu1 %v1368_v8 }
 0x2e2   : > { %1089 = vmatmul.mubr.msk.bf16.vlgmr.msra.gmra.mxu1 %vm366_vm2, %v708_v35 }
 0x2e3   : > { %1102 = vmatprep.mubr.msk.bf16.mxu1 %vm1369_vm1, %v1368_v8 }
 0x38a   : > { %v407_v36 = vpop.f32.mrf.mxu1 }
 0x38b   : > { %v413_v37 = vsel %vm366_vm2, %v407_v36, -inf }
 0x38c   : > { %414 = vmax.xlane.f32.xlu1 %v413_v37  ;;  %v1054_v38 = vpop.f32.mrf.mxu1 }
 0x38e   : > { %v410_v39 = vpop.f32.mrf.mxu1 }
 0x390   : > { %v1055_v40 = vpop.f32.mrf.mxu1 }
 0x392   : > { %v519_v41 = vpop.f32.mrf.mxu1 }
 0x393   : > { %v525_v42 = vsel %vm366_vm2, %v519_v41, -inf }
 0x394   : > { %526 = vmax.xlane.f32.xlu0 %v525_v42  ;;  %v1066_v43 = vpop.f32.mrf.mxu1 }
 0x396   : > { %v522_v44 = vpop.f32.mrf.mxu1 }
 0x397   : > { %v1194_v44 = vld [vmem:[#allocation8] sm:$0xff]  }
 0x398   : > { %v1067_v45 = vpop.f32.mrf.mxu1 }
 0x39a   : > { %v635_v46 = vpop.f32.mrf.mxu1 }
 0x39b   : > { %v641_v55 = vsel %vm366_vm2, %v635_v46, -inf }
 0x39c   : > { %v1078_v47 = vpop.f32.mrf.mxu1 }
 0x39d   : > { %423 = vrot.lane.b32.xlu1 %v1566_v21, %s1377_s9  ;;  %s1293_s9 = scalar_lea.vmem %s1636_s30, 128 }
 0x39e   : > { %v638_v48 = vpop.f32.mrf.mxu1  ;;  %p1294_p11 = scmp.ne.s32.totalorder %s1636_s30, %s1293_s9 }
 0x3a0   : > { %v1079_v49 = vpop.f32.mrf.mxu1  ;;  %p1295_p1 = pnand %p1294_p11, %p1699_p0 }
 0x3a2   : > { %v751_v50 = vpop.f32.mrf.mxu1  ;;  %p1296_p2 = pneg %p1295_p1 }
 0x3a3   : > { %v757_v51 = vsel %vm366_vm2, %v751_v50, -inf }
 0x3a4   : > { %758 = vmax.xlane.f32.xlu0 %v757_v51  ;;  %v1090_v52 = vpop.f32.mrf.mxu1 }
 0x3a6   : > { %v754_v53 = vpop.f32.mrf.mxu1 }
 0x3a8   : > { %v1091_v54 = vpop.f32.mrf.mxu1 }
 0x3ba   : > { %535 = vrot.lane.b32.xlu0 %v1566_v21, %s1378_s16  ;;  %s1299_s16 = scalar_lea.vmem %s1298_s14, 256 }
 0x3bb   : > { %p1301_p12 = scmp.lt.s32.totalorder %s1299_s16, %s1293_s9 }
 0x3bd   : > { %p1302_p7 = por %p1301_p12, %p1300_p6 }
 0x3bf   : > { %p1303_p9 = pnand %p1302_p7, %p1296_p2 }
 0x3c1   : > { %642 = vmax.xlane.f32.xlu1 %v641_v55 }
 0x3d2   : > { %651 = vrot.lane.b32.xlu1 %v1566_v21, %s1379_s17 }
 0x3d6   : > { %767 = vrot.lane.b32.xlu1 %v1566_v21, %s1380_s24 }
 0x415   : > { %v415_v56 = vpop.xlane.xlu1 %414 }
 0x416   : > { %v416_v57 = vsub.f32 %v407_v36, %v415_v56 }
 0x418   : > { %v417_v58 = vmul.f32 1.442695, %v416_v57 }
 0x419   : > { %v424_v59 = vpop.permute.xlu1 %423 }
 0x41a   : > { %1197 = vpow2.f32 %v417_v58  ;;  %v430_v60 = vsel %vm428_vm3, %v424_v59, 0 }
 0x41b   : > { %1057 = vmatpush3.bf16.msra.mxu0 %v430_v60 }
 0x41c   : > { %1068 = vmatprep.subr.bf16.mxu0 %v1368_v8 }
 0x41d   : > { %v527_v61 = vpop.xlane.xlu0 %526 }
 0x41e   : > { %v528_v62 = vsub.f32 %v519_v41, %v527_v61  ;;  %v1193_v41 = vld [vmem:[#allocation8 + $0x8] sm:$0xff]  }
 0x41f   : > { %1099 = vmatpush3.bf16.msra.mxu1 %v1193_v41 }
 0x420   : > { %v529_v63 = vmul.f32 1.442695, %v528_v62  ;;  %1100 = vmatprep.subr.bf16.mxu1 %v1368_v8 }
 0x422   : > { %1199 = vpow2.f32 %v529_v63 }
 0x423   : > { %1101 = vmatpush3.bf16.msra.mxu1 %v1194_v44 }
 0x427   : > { %v1198_v0 = vpop.eup %1197 }
 0x428   : > { %v422_v1 = vpack.c.bf16 %v1198_v0, %v1198_v0  ;;  %v419_v13 = vsel %vm366_vm2, %v1198_v0, 0.0 }
 0x42a   : > { %1059 = vmatmul.mubr.msk.bf16.vlgmr.msra.gmra.mxu0 %vm366_vm2, %v422_v1 }
 0x42b   : > { %1070 = vmatprep.mubr.msk.bf16.mxu0 %vm1369_vm1, %v1368_v8 }
 0x42d   : > { %v759_v2 = vpop.xlane.xlu0 %758 }
 0x42e   : > { %v760_v3 = vsub.f32 %v751_v50, %v759_v2 }
 0x42f   : > { %v1200_v4 = vpop.eup %1199 }
 0x430   : > { %v761_v5 = vmul.f32 1.442695, %v760_v3  ;;  %v531_v6 = vsel %vm366_vm2, %v1200_v4, 0.0  ;;  %v534_v10 = vpack.c.bf16 %v1200_v4, %v1200_v4 }
 0x431   : > { %532 = vadd.xlane.f32.xlu0 %v531_v6  ;;  %v536_v7 = vpop.permute.xlu0 %535 }
 0x432   : > { %1201 = vpow2.f32 %v761_v5  ;;  %v541_v9 = vsel %vm428_vm3, %v536_v7, 0 }
 0x433   : > { %1069 = vmatpush3.bf16.msra.mxu0 %v541_v9 }
 0x434   : > { %1080 = vmatprep.subr.bf16.mxu0 %v1368_v8 }
 0x436   : > { %1071 = vmatmul.mubr.msk.bf16.vlgmr.msra.gmra.mxu0 %vm366_vm2, %v534_v10 }
 0x437   : > { %1082 = vmatprep.mubr.msk.bf16.mxu0 %vm1369_vm1, %v1368_v8 }
 0x43f   : > { %v1202_v11 = vpop.eup %1201 }
 0x440   : > { %v763_v12 = vsel %vm366_vm2, %v1202_v11, 0.0  ;;  %v766_v24 = vpack.c.bf16 %v1202_v11, %v1202_v11 }
 0x441   : > { %764 = vadd.xlane.f32.xlu0 %v763_v12 }
 0x445   : > { %420 = vadd.xlane.f32.xlu0 %v419_v13 }
 0x44a   : > { %v643_v14 = vpop.xlane.xlu1 %642 }
 0x44b   : > { %v644_v15 = vsub.f32 %v635_v46, %v643_v14 }
 0x44d   : > { %v645_v16 = vmul.f32 1.442695, %v644_v15 }
 0x44e   : > { %v652_v17 = vpop.permute.xlu1 %651 }
 0x44f   : > { %1203 = vpow2.f32 %v645_v16  ;;  %v657_v18 = vsel %vm428_vm3, %v652_v17, 0 }
 0x450   : > { %1081 = vmatpush3.bf16.msra.mxu0 %v657_v18 }
 0x451   : > { %1092 = vmatprep.subr.bf16.mxu0 %v1368_v8 }
 0x452   : > { %v768_v20 = vpop.permute.xlu1 %767 }
 0x453   : > { %v773_v23 = vsel %vm428_vm3, %v768_v20, 0 }
 0x45c   : > { %v1204_v19 = vpop.eup %1203 }
 0x45d   : > { %v647_v21 = vsel %vm366_vm2, %v1204_v19, 0.0  ;;  %v650_v22 = vpack.c.bf16 %v1204_v19, %v1204_v19 }
 0x45e   : > { %648 = vadd.xlane.f32.xlu1 %v647_v21 }
 0x45f   : > { %1083 = vmatmul.mubr.msk.bf16.vlgmr.msra.gmra.mxu0 %vm366_vm2, %v650_v22 }
 0x460   : > { %1093 = vmatpush3.bf16.msra.mxu0 %v773_v23  ;;  %1094 = vmatprep.mubr.msk.bf16.mxu0 %vm1369_vm1, %v1368_v8 }
 0x467   : > { %1095 = vmatmul.mubr.msk.bf16.vlgmr.msra.gmra.mxu0 %vm366_vm2, %v766_v24 }
 0x4ba   : > { %v533_v25 = vpop.xlane.xlu0 %532 }
 0x4ca   : > { %v765_v26 = vpop.xlane.xlu0 %764 }
 0x4ce   : > { %v421_v27 = vpop.xlane.xlu0 %420 }
 0x4cf   : > { %1205 = vrcp.f32 %v421_v27 }
 0x4d0   : > { %1207 = vrcp.f32 %v533_v25 }
 0x4dc   : > { %v1206_v28 = vpop.eup %1205 }
 0x4dd   : > { %v1208_v34 = vpop.eup %1207 }
 0x4e7   : > { %v649_v40 = vpop.xlane.xlu1 %648 }
 0x4e8   : > { %1209 = vrcp.f32 %v649_v40 }
 0x4e9   : > { %1211 = vrcp.f32 %v765_v26 }
 0x4ea   : > { %v466_v29 = vpop.f32.mrf.mxu0 }
 0x4eb   : > { %v473_v30 = vmul.f32 %v1206_v28, %v466_v29 }
 0x4ec   : > { %v1060_v31 = vpop.f32.mrf.mxu0 }
 0x4ed   : > { %474 = vst.msk [vmem:[#allocation2] sm:$0xff] %vm366_vm2, %v473_v30 }
 0x4ee   : > { %v469_v32 = vpop.f32.mrf.mxu0 }
 0x4f0   : > { %v1061_v33 = vpop.f32.mrf.mxu0 }
 0x4f5   : > { %v1210_v42 = vpop.eup %1209 }
 0x4f6   : > { %v577_v35 = vpop.f32.mrf.mxu0  ;;  %v1212_v49 = vpop.eup %1211 }
 0x4f7   : > { %v584_v36 = vmul.f32 %v1208_v34, %v577_v35 }
 0x4f8   : > { %v1072_v37 = vpop.f32.mrf.mxu0 }
 0x4f9   : > { %586 = vrot.lane.b32.xlu1 %v584_v36, %s1381_s26 }
 0x4fa   : > { %v580_v38 = vpop.f32.mrf.mxu0 }
 0x4fc   : > { %v1073_v39 = vpop.f32.mrf.mxu0 }
 0x51f   : > { %v693_v43 = vpop.f32.mrf.mxu0 }
 0x520   : > { %v700_v45 = vmul.f32 %v1210_v42, %v693_v43 }
 0x521   : > { %v1084_v46 = vpop.f32.mrf.mxu0 }
 0x522   : > { %702 = vrot.lane.b32.xlu0 %v700_v45, %s1382_s8 }
 0x523   : > { %v696_v47 = vpop.f32.mrf.mxu0 }
 0x525   : > { %v1085_v48 = vpop.f32.mrf.mxu0 }
 0x527   : > { %v809_v50 = vpop.f32.mrf.mxu0 }
 0x528   : > { %v816_v51 = vmul.f32 %v1212_v49, %v809_v50 }
 0x529   : > { %v1096_v52 = vpop.f32.mrf.mxu0 }
 0x52a   : > { %818 = vrot.lane.b32.xlu1 %v816_v51, %s1383_s10 }
 0x52b   : > { %v812_v53 = vpop.f32.mrf.mxu0 }
 0x52d   : > { %v1097_v54 = vpop.f32.mrf.mxu0 }
 0x56b   : > { %v587_v55 = vpop.permute.xlu1 %586 }
 0x56c   : > { %590 = vst.msk [vmem:[#allocation2] sm:$0xff] %vm589_vm4, %v587_v55 }
 0x594   : > { %v703_v8 = vpop.permute.xlu0 %702 }
 0x595   : > { %706 = vst.msk [vmem:[#allocation2] sm:$0xff] %vm705_vm5, %v703_v8 }
 0x59c   : > { %v819_v56 = vpop.permute.xlu1 %818 }
 0x59d   : > { %822 = vst.msk [vmem:[#allocation2] sm:$0xff] %vm821_vm6, %v819_v56 }
 0x5a4   : > { %v823_v57 = vld [vmem:[#allocation2] sm:$0xff] }
 0x5a5   : > { %v824_v58 = vpack.c.bf16 %v823_v57, %v823_v57 }
 0x5a7   : > { %1103 = vmatmul.mubr.msk.bf16.vlgmr.msra.gmra.mxu1 %vm271_vm0, %v824_v58 }
 0x667   : > { %v878_v59 = vpop.f32.mrf.mxu1 }
 0x668   : > { %884 = vst.msk [vmem:[%s268_s12] sm:$0xff] %vm271_vm0, %v878_v59 }
 0x669   : > { %v1104_v60 = vpop.f32.mrf.mxu1 }
 0x66a   : > { %1306 = shalt.err (!%p1303_p9)
}
 0x66b   : > { %s1307_s17 = scalar_lea.hbm %s1634_s28, 128  ;;  %s1311_s26 = scalar_lea.hbm %s1683_s5, 256 }
 0x66c   : > { %p1308_p13 = scmp.ne.s32.totalorder %s1634_s28, %s1307_s17  ;;  %p1312_p4 = scmp.lt.s32.totalorder %s1634_s28, %s1683_s5 }
 0x66d   : > { %p1313_p8 = scmp.lt.s32.totalorder %s1311_s26, %s1307_s17 }
 0x66e   : > { %p1309_p5 = pnand %p1308_p13, %p1699_p0 }
 0x66f   : > { %p1314_p3 = por %p1313_p8, %p1312_p4 }
 0x670   : > { %p1310_p10 = pneg %p1309_p5 }
 0x672   : > { %p1315_p11 = pnand %p1314_p3, %p1310_p10 }
 0x674   : > { %1318 = shalt.err (!%p1315_p11)
}
 0x675   : > { %1116 = dma.vmem_to_hbm [thread:$0]  (%p1699_p0), %s1636_s30, 128, %s1634_s28, %s886_s7   ;;  %v881_v61 = vpop.f32.mrf.mxu1 }
 0x677   : > { %v1105_v62 = vpop.f32.mrf.mxu1 }
 0x678 PF: > { %s911_s11 = sand.u32 1, %s1349_s18   ;;  %p1700_p1 = scmp.ne.s32.totalorder %s1689_s25, 0 }
 0x679   : > { %p1701_p2 = scmp.ge.s32.totalorder %s1361_s21, 2  ;;  %s912_s12 = scalar_lea.sflag [#allocation5], %s911_s11 }
 0x67b   : > { %p1130_p6 = pnand %p1701_p2, %p1700_p1 }
 0x67d   : > { %p1131_p12 = pneg %p1130_p6 }
 0x67f   : > { %1344 = dma.done.wait (%p1131_p12), %s912_s12, 128  }
 0x680   : > { %1346 = vsyncadd (%p1131_p12), %s912_s12, 4294967168  ;;  %p19_p0 = scmp.ge.s32.totalorder %s1487_s15, 4   ;;  %s1702_s18 = smov %s1353_s19 }
 0x681   : > { %s1703_s19 = smov %s1357_s20  ;;  %s1704_s20 = smov %s1503_s27 }
 0x682   : > { %s1705_s21 = smov %s1487_s15  ;;  %21 = sbr.rel (!%p19_p0) target bundleno = 6 (0x6), region = 93 }
 0x687   :  { %917 = vsyncpa [#allocation4], 1 }
 0x688   :  { %919 = vsyncpa [#allocation4 + $0x1], 1 }
 0x689   :  { %920 = vsyncpa [#allocation7], 1 }
 0x68a   :  { %921 = vsyncpa [#allocation5], 1 }
 0x68b   :  { %923 = vsyncpa [#allocation5 + $0x1], 1 }

</bundles_post_ra>
